<compile_context>
chip_gen: v7x
topology: tpu7x:2x2x1
jax: 0.10.0
libtpu: 0.0.40
codegen_flags: <defaults>
</compile_context>

<pallas_src>
import functools

import numpy as np
import jax
import jax.numpy as jnp
from jax.experimental import pallas as pl
from jax.experimental.pallas import tpu as pltpu

# The 30 fixed anchor colors from RGB_Conv2d.__init__ (normalized by 255).
_RGB_ANCHORS = [
    [255, 255, 255], [219, 178, 187], [210, 144, 98], [230, 79, 56],
    [207, 62, 108], [130, 44, 28], [91, 31, 58], [209, 215, 63],
    [194, 202, 119], [224, 148, 36], [105, 147, 29], [131, 104, 50],
    [115, 233, 72], [189, 211, 189], [109, 215, 133], [72, 131, 77],
    [69, 81, 65], [77, 212, 193], [101, 159, 190], [120, 142, 215],
    [121, 102, 215], [111, 42, 240], [75, 42, 185], [57, 41, 119],
    [42, 46, 71], [216, 129, 199], [214, 67, 205], [147, 107, 128],
    [136, 48, 133], [0, 0, 0],
]


def _rgb_conv2d_kernel_flat(w_ref, x_ref, o_ref, *, kh, kw, wp, lc, n_out):
    """stride == 1 fast path (anchors on sublanes, flattened pixels on lanes).

    w_ref: VMEM f32[C, 8]  per-anchor constants:
           [R2, (2/765)*G2, B2, s^2*(2+R2/512), s^2*(2+255/256-R2/512), pad..]
           with s = 1/765.
    x_ref: VMEM f32[Bt, 3*lc]  channel c of the (spatially padded) image is
           flattened at lane offset c*lc; lc >= Hp*Wp + kw - 1, 128-aligned.
    o_ref: [Bt, C, n_out]  n_out = OH*Wp (full rows; the kw-1 invalid right
           columns per row are sliced off by the wrapper for free).
    """
    bt = x_ref.shape[0]
    n_anchor = o_ref.shape[1]
    span = n_out + kw - 1
    inv_mean = 255.0 / (kh * kw)          # window mean already in 0..255 units
    s = 1.0 / 765.0

    def box_sum(c):
        # Separable box-sum in flattened lane coordinates:
        #   kh row-shifted adds (lane shift = ki*wp), then kw column shifts.
        base = c * lc
        rs = x_ref[:, base:base + span]
        for ki in range(1, kh):
            off = base + ki * wp
            rs = rs + x_ref[:, off:off + span]
        acc = rs[:, 0:n_out]
        for kj in range(1, kw):
            acc = acc + rs[:, kj:kj + n_out]
        return acc

    acc_r = box_sum(0)
    acc_g = box_sum(1)
    acc_b = box_sum(2)

    # Per-pixel (Bt, n_out) quantities, pre-scaled so the dominant
    # (Bt, C, n_out) anchor phase needs no standalone "* 4" or "* 1/765":
    #   dist/765 = sqrt(s^2*coefA*dR^2 + (2s*dG)^2 + s^2*coefB*dB^2 + s^2*eps)
    r1 = acc_r * inv_mean                        # R1            (for dR)
    g1s = acc_g * (inv_mean * 2.0 * s)           # 2*s*G1        (for dG term)
    b1 = acc_b * inv_mean                        # B1            (for dB)
    r1hs = acc_r * (inv_mean * s * s / 512.0)    # s^2 * R1/512  (coefA/coefB)

    # Hoist the sublane broadcasts once (JAX does not CSE broadcast_in_dim).
    shp = (bt, n_anchor, n_out)
    r1b = jnp.broadcast_to(r1[:, None, :], shp)
    g1b = jnp.broadcast_to(g1s[:, None, :], shp)
    b1b = jnp.broadcast_to(b1[:, None, :], shp)
    r1hb = jnp.broadcast_to(r1hs[:, None, :], shp)

    w_tab = w_ref[...]                           # (C, 8)
    r2 = w_tab[:, 0:1][None]                     # (1, C, 1)
    g2s = w_tab[:, 1:2][None]
    b2 = w_tab[:, 2:3][None]
    c1s = w_tab[:, 3:4][None]
    c2s = w_tab[:, 4:5][None]

    dR = r1b - r2
    dG = g1b - g2s                               # already carries the 2*s factor
    dB = b1b - b2
    coef_a = c1s + r1hb                          # s^2 * (2 + rmean/256)
    coef_b = c2s - r1hb                          # s^2 * (2 + (255-rmean)/256)
    d2 = coef_a * (dR * dR) + dG * dG + coef_b * (dB * dB) + (1e-8 * s * s)
    # TODO(synk): on v7x, re-express d2 as a [Bt*n_out, K] x [K, C] MXU matmul
    # of per-pixel features against per-anchor coefficients (f32 accumulation).
    o_ref[...] = jnp.sqrt(d2).astype(o_ref.dtype)


def _rgb_conv2d_kernel_generic(w_ref, x_ref, o_ref, *, kh, kw, stride, oh, ow):
    """Generic fallback (any stride), one image per grid step.

    w_ref: SMEM f32[C*3]  (normalized anchor colors, flattened row-major)
    x_ref: VMEM f32[1, 3, Hp, Wp]
    o_ref: VMEM f32[1, C, OH, OW]
    """
    # TODO(synk): vectorize this path like the fast path if stride != 1 ever
    # becomes common (currently 30 unrolled passes with narrow masked stores).
    x = x_ref[0]  # (3, Hp, Wp)
    acc = jnp.zeros((3, oh, ow), jnp.float32)
    for ki in range(kh):
        for kj in range(kw):
            acc = acc + x[:,
                          ki:ki + (oh - 1) * stride + 1:stride,
                          kj:kj + (ow - 1) * stride + 1:stride]
    mean = acc * (1.0 / (kh * kw))
    R1 = mean[0] * 255.0
    G1 = mean[1] * 255.0
    B1 = mean[2] * 255.0

    n_colors = o_ref.shape[1]
    for c in range(n_colors):
        R2 = w_ref[3 * c + 0] * 255.0
        G2 = w_ref[3 * c + 1] * 255.0
        B2 = w_ref[3 * c + 2] * 255.0
        rmean = (R1 + R2) * 0.5
        dR = R1 - R2
        dG = G1 - G2
        dB = B1 - B2
        dist = jnp.sqrt((2.0 + rmean / 256.0) * dR * dR
                        + 4.0 * dG * dG
                        + (2.0 + (255.0 - rmean) / 256.0) * dB * dB
                        + 1e-8)
        o_ref[0, c] = (dist * (1.0 / 765.0)).astype(o_ref.dtype)


def rgb_conv2d(x, weights, kernel_size, stride=1, padding=0,
               out_dtype=jnp.float32):
    """Pallas implementation of RGB_Conv2d.forward.

    x:       f32[N, 3, H, W]   (NCHW, same as PyTorch)
    weights: f32[C, 3]         (normalized anchor colors, C == out_channels)
    out_dtype: output dtype (bf16 halves the dominant HBM write on v5e, but
               changes numerics; default f32 matches the PyTorch module).
    returns: [N, C, OH, OW]
    """
    kh, kw = kernel_size
    n, c, h, w = x.shape
    assert c == 3, "RGB_Conv2d expects 3 input channels"
    oh = (h + 2 * padding - kh) // stride + 1
    ow = (w + 2 * padding - kw) // stride + 1
    n_anchor = weights.shape[0]

    x = x.astype(jnp.float32)
    if padding > 0:
        # TODO(synk): fold zero-padding into the kernel (edge masking) to avoid
        # this extra HBM read+write of the input.
        x = jnp.pad(x, ((0, 0), (0, 0), (padding, padding), (padding, padding)))
    hp, wp = h + 2 * padding, w + 2 * padding

    if stride != 1:
        # Generic path (rare): per-color loop, one image per grid step.
        w_flat = weights.reshape(-1).astype(jnp.float32)
        kernel = functools.partial(_rgb_conv2d_kernel_generic,
                                   kh=kh, kw=kw, stride=stride, oh=oh, ow=ow)
        return pl.pallas_call(
            kernel,
            out_shape=jax.ShapeDtypeStruct((n, n_anchor, oh, ow), out_dtype),
            grid=(n,),
            in_specs=[
                pl.BlockSpec(memory_space=pltpu.MemorySpace.SMEM),
                pl.BlockSpec((1, 3, hp, wp), lambda b: (b, 0, 0, 0)),
            ],
            out_specs=pl.BlockSpec((1, n_anchor, oh, ow),
                                   lambda b: (b, 0, 0, 0)),
            compiler_params=pltpu.CompilerParams(
                dimension_semantics=("parallel",)),
        )(w_flat, x)

    # ---------------- stride == 1 fast path ---------------------------------
    L = hp * wp                        # flattened padded-image length
    n_out = oh * wp                    # full output rows (incl. kw-1 invalid
                                       # right columns per row, sliced later)
    lc = -(-(L + kw - 1) // 128) * 128  # per-channel lane stride, 128-aligned,
                                        # >= L + kw - 1 so kj shifts stay in bounds

    # Anchor-derived constants, pre-scaled (see kernel docstring).
    s = 1.0 / 765.0
    wf = weights.astype(jnp.float32)
    r2 = wf[:, 0] * 255.0
    g2 = wf[:, 1] * 255.0
    b2 = wf[:, 2] * 255.0
    table = jnp.stack(
        [r2,
         g2 * (2.0 * s),
         b2,
         (2.0 + r2 * (1.0 / 512.0)) * (s * s),
         (2.0 + 255.0 / 256.0 - r2 * (1.0 / 512.0)) * (s * s)], axis=1)
    table = jnp.pad(table, ((0, 0), (0, 3)))            # (C, 8)

    # ---- batch-tile sizing with padding-aware VMEM accounting ---------------
    try:
        kind = jax.devices()[0].device_kind.lower()
    except Exception:
        kind = ""
    num_tc = 2 if "v7" in kind else 1                   # only v7x has 2 TCs/chip
    if "v7" in kind:                                    # 64 MiB physical VMEM
        budget, vmem_limit = 24 << 20, 36 << 20
    elif ("v5" in kind) or ("v6" in kind):              # 128 MiB physical VMEM
        budget, vmem_limit = 80 << 20, 100 << 20
    else:                                               # unknown chip: conservative
        budget, vmem_limit = 12 << 20, None

    n_out_pad = -(-n_out // 128) * 128                  # lane padding of out block
    slab = 32 * n_out_pad * 4                           # one (30->32, n_out_pad) f32 plane
    # Per batch element: 2x double-buffered input row (lane dim 3*lc already
    # 128-aligned), 2x double-buffered output plane, and ~10 live intermediate
    # (Bt, C, n_out) slabs inside the kernel.
    per_elem = 2 * (3 * lc) * 4 + 12 * slab
    fixed = 2 * 8 * (3 * lc) * 4 + 2 * 32 * 128 * 4     # sublane-rounding slack + table
    bt = int(max(1, min(n, 128, (budget - fixed) // per_elem)))
    if num_tc > 1 and n >= 16:
        bt = min(bt, pl.cdiv(n, num_tc))                # >=2 parallel steps on v7x megacore
    if bt >= n:
        bt = n                                          # single step: block batch dim == full
    elif bt >= 8:
        bt = (bt // 8) * 8                              # sublane-aligned input block
    else:
        bt = 1                                          # very large images: one per step
    n_pad = pl.cdiv(n, bt) * bt
    # TODO(synk): add a spatial (lane-axis) grid dim with a (kh-1)*wp+kw halo for
    # images so large that even bt=1 overflows VMEM (matters on v7x, 64 MiB).

    # Pack the 3 channels along the lane axis at stride lc (avoids the 3->8
    # sublane padding of a (Bt, 3, L) block); the per-channel tail pad also
    # gives the kj shifts in-bounds headroom (garbage lands only in discarded
    # output columns).
    xf = jnp.pad(x.reshape(n, 3, L),
                 ((0, n_pad - n), (0, 0), (0, lc - L))).reshape(n_pad, 3 * lc)

    kernel = functools.partial(_rgb_conv2d_kernel_flat,
                               kh=kh, kw=kw, wp=wp, lc=lc, n_out=n_out)
    out = pl.pallas_call(
        kernel,
        out_shape=jax.ShapeDtypeStruct((n_pad, n_anchor, n_out), out_dtype),
        grid=(n_pad // bt,),
        in_specs=[
            pl.BlockSpec((n_anchor, 8), lambda b: (0, 0)),      # anchor table
            pl.BlockSpec((bt, 3 * lc), lambda b: (b, 0)),       # packed image tile
        ],
        out_specs=pl.BlockSpec((bt, n_anchor, n_out), lambda b: (b, 0, 0)),
        compiler_params=pltpu.CompilerParams(
            dimension_semantics=("parallel",),
            vmem_limit_bytes=vmem_limit),
    )(table, xf)

    # (n_pad, C, oh*wp) -> (n, C, oh, wp) is a free reshape; dropping the kw-1
    # invalid right columns is the only remaining slice (fuses into the
    # consumer).  No extra pad/repack HBM pass over the 30-channel output.
    return out[:n].reshape(n, n_anchor, oh, wp)[:, :, :, :ow]


def _reference(x, weights, kernel_size, stride, padding):
    """Straightforward numpy re-implementation of the PyTorch forward."""
    x = np.asarray(x, dtype=np.float64)
    w = np.asarray(weights, dtype=np.float64)          # (30, 3), normalized
    n, _, h, wid = x.shape
    kh, kw = kernel_size
    xp = np.pad(x, ((0, 0), (0, 0), (padding, padding), (padding, padding)))
    oh = (h + 2 * padding - kh) // stride + 1
    ow = (wid + 2 * padding - kw) // stride + 1
    out = np.zeros((n, w.shape[0], oh, ow), dtype=np.float64)
    R2, G2, B2 = w[:, 0] * 255.0, w[:, 1] * 255.0, w[:, 2] * 255.0
    for b in range(n):
        for oy in range(oh):
            for ox in range(ow):
                patch = xp[b, :, oy * stride:oy * stride + kh,
                           ox * stride:ox * stride + kw]
                mean = patch.reshape(3, -1).mean(axis=-1) * 255.0
                R1, G1, B1 = mean
                rmean = (R1 + R2) / 2.0
                dR, dG, dB = R1 - R2, G1 - G2, B1 - B2
                d = np.sqrt((2.0 + rmean / 256.0) * dR ** 2 + 4.0 * dG ** 2
                            + (2.0 + (255.0 - rmean) / 256.0) * dB ** 2 + 1e-8)
                out[b, :, oy, ox] = d / 765.0
    return out


if __name__ == "__main__":
    # Small shapes consistent with the module: batch=2, RGB input 16x16,
    # kernel 3x3, stride 1, padding 0 -> output (2, 30, 14, 14).
    key = jax.random.PRNGKey(0)
    x = jax.random.uniform(key, (2, 3, 16, 16), dtype=jnp.float32)

    weights = jnp.asarray(np.array(_RGB_ANCHORS, dtype=np.float32) / 255.0)
    kernel_size = (3, 3)
    stride = 1
    padding = 0

    out = rgb_conv2d(x, weights, kernel_size, stride=stride, padding=padding)
    out = jax.block_until_ready(out)

    ref = _reference(np.asarray(x), np.asarray(weights), kernel_size, stride, padding)
    np.testing.assert_allclose(np.asarray(out), ref, rtol=1e-4, atol=1e-5)

    print("KERNEL_OK")
</pallas_src>

<mosaic_0001>
module attributes {stable_mosaic.version = 11 : i64} {
  func.func @_rgb_conv2d_kernel_flat(%arg0: i32, %arg1: memref<30x8xf32, #tpu.memory_space<vmem>>, %arg2: memref<2x1152xf32, #tpu.memory_space<vmem>>, %arg3: memref<2x30x224xf32, #tpu.memory_space<vmem>>) attributes {dimension_semantics = [#tpu.dimension_semantics<parallel>], iteration_bounds = array<i64: 1>, scalar_prefetch = 0 : i64, scratch_operands = 0 : i64, tpu.core_type = #tpu.core_type<tc>, window_params = [{pipeline_mode = #tpu.pipeline_mode<synchronous>, transform_indices = @transform_0, window_bounds = array<i64: 30, 8>}, {transform_indices = @transform_1, window_bounds = array<i64: 2, 1152>}, {transform_indices = @transform_2, window_bounds = array<i64: 2, 30, 224>}]} {
    %c0 = arith.constant 0 : index
    %c0_0 = arith.constant 0 : index
    %0 = vector.load %arg2[%c0, %c0_0] : memref<2x1152xf32, #tpu.memory_space<vmem>>, vector<2x226xf32>
    %c0_1 = arith.constant 0 : index
    %c16 = arith.constant 16 : index
    %1 = vector.load %arg2[%c0_1, %c16] : memref<2x1152xf32, #tpu.memory_space<vmem>>, vector<2x226xf32>
    %2 = arith.addf %0, %1 : vector<2x226xf32>
    %c0_2 = arith.constant 0 : index
    %c32 = arith.constant 32 : index
    %3 = vector.load %arg2[%c0_2, %c32] : memref<2x1152xf32, #tpu.memory_space<vmem>>, vector<2x226xf32>
    %4 = arith.addf %2, %3 : vector<2x226xf32>
    %5 = vector.extract_strided_slice %4 {offsets = [0, 0], sizes = [2, 224], strides = [1, 1]} : vector<2x226xf32> to vector<2x224xf32>
    %6 = vector.extract_strided_slice %4 {offsets = [0, 1], sizes = [2, 224], strides = [1, 1]} : vector<2x226xf32> to vector<2x224xf32>
    %7 = arith.addf %5, %6 : vector<2x224xf32>
    %8 = vector.extract_strided_slice %4 {offsets = [0, 2], sizes = [2, 224], strides = [1, 1]} : vector<2x226xf32> to vector<2x224xf32>
    %9 = arith.addf %7, %8 : vector<2x224xf32>
    %c0_3 = arith.constant 0 : index
    %c384 = arith.constant 384 : index
    %10 = vector.load %arg2[%c0_3, %c384] : memref<2x1152xf32, #tpu.memory_space<vmem>>, vector<2x226xf32>
    %c0_4 = arith.constant 0 : index
    %c400 = arith.constant 400 : index
    %11 = vector.load %arg2[%c0_4, %c400] : memref<2x1152xf32, #tpu.memory_space<vmem>>, vector<2x226xf32>
    %12 = arith.addf %10, %11 : vector<2x226xf32>
    %c0_5 = arith.constant 0 : index
    %c416 = arith.constant 416 : index
    %13 = vector.load %arg2[%c0_5, %c416] : memref<2x1152xf32, #tpu.memory_space<vmem>>, vector<2x226xf32>
    %14 = arith.addf %12, %13 : vector<2x226xf32>
    %15 = vector.extract_strided_slice %14 {offsets = [0, 0], sizes = [2, 224], strides = [1, 1]} : vector<2x226xf32> to vector<2x224xf32>
    %16 = vector.extract_strided_slice %14 {offsets = [0, 1], sizes = [2, 224], strides = [1, 1]} : vector<2x226xf32> to vector<2x224xf32>
    %17 = arith.addf %15, %16 : vector<2x224xf32>
    %18 = vector.extract_strided_slice %14 {offsets = [0, 2], sizes = [2, 224], strides = [1, 1]} : vector<2x226xf32> to vector<2x224xf32>
    %19 = arith.addf %17, %18 : vector<2x224xf32>
    %c0_6 = arith.constant 0 : index
    %c768 = arith.constant 768 : index
    %20 = vector.load %arg2[%c0_6, %c768] : memref<2x1152xf32, #tpu.memory_space<vmem>>, vector<2x226xf32>
    %c0_7 = arith.constant 0 : index
    %c784 = arith.constant 784 : index
    %21 = vector.load %arg2[%c0_7, %c784] : memref<2x1152xf32, #tpu.memory_space<vmem>>, vector<2x226xf32>
    %22 = arith.addf %20, %21 : vector<2x226xf32>
    %c0_8 = arith.constant 0 : index
    %c800 = arith.constant 800 : index
    %23 = vector.load %arg2[%c0_8, %c800] : memref<2x1152xf32, #tpu.memory_space<vmem>>, vector<2x226xf32>
    %24 = arith.addf %22, %23 : vector<2x226xf32>
    %25 = vector.extract_strided_slice %24 {offsets = [0, 0], sizes = [2, 224], strides = [1, 1]} : vector<2x226xf32> to vector<2x224xf32>
    %26 = vector.extract_strided_slice %24 {offsets = [0, 1], sizes = [2, 224], strides = [1, 1]} : vector<2x226xf32> to vector<2x224xf32>
    %27 = arith.addf %25, %26 : vector<2x224xf32>
    %28 = vector.extract_strided_slice %24 {offsets = [0, 2], sizes = [2, 224], strides = [1, 1]} : vector<2x226xf32> to vector<2x224xf32>
    %29 = arith.addf %27, %28 : vector<2x224xf32>
    %cst = arith.constant 28.333334 : f32
    %30 = vector.broadcast %cst : f32 to vector<2x224xf32>
    %31 = arith.mulf %9, %30 : vector<2x224xf32>
    %cst_9 = arith.constant 0.0740740746 : f32
    %32 = vector.broadcast %cst_9 : f32 to vector<2x224xf32>
    %33 = arith.mulf %19, %32 : vector<2x224xf32>
    %cst_10 = arith.constant 28.333334 : f32
    %34 = vector.broadcast %cst_10 : f32 to vector<2x224xf32>
    %35 = arith.mulf %29, %34 : vector<2x224xf32>
    %cst_11 = arith.constant 9.45594252E-8 : f32
    %36 = vector.broadcast %cst_11 : f32 to vector<2x224xf32>
    %37 = arith.mulf %9, %36 : vector<2x224xf32>
    %38 = vector.shape_cast %31 : vector<2x224xf32> to vector<2x1x224xf32>
    %39 = vector.shape_cast %38 : vector<2x1x224xf32> to vector<2x1x224xf32>
    %40 = vector.broadcast %39 : vector<2x1x224xf32> to vector<2x30x224xf32>
    %41 = vector.shape_cast %33 : vector<2x224xf32> to vector<2x1x224xf32>
    %42 = vector.shape_cast %41 : vector<2x1x224xf32> to vector<2x1x224xf32>
    %43 = vector.broadcast %42 : vector<2x1x224xf32> to vector<2x30x224xf32>
    %44 = vector.shape_cast %35 : vector<2x224xf32> to vector<2x1x224xf32>
    %45 = vector.shape_cast %44 : vector<2x1x224xf32> to vector<2x1x224xf32>
    %46 = vector.broadcast %45 : vector<2x1x224xf32> to vector<2x30x224xf32>
    %47 = vector.shape_cast %37 : vector<2x224xf32> to vector<2x1x224xf32>
    %48 = vector.shape_cast %47 : vector<2x1x224xf32> to vector<2x1x224xf32>
    %49 = vector.broadcast %48 : vector<2x1x224xf32> to vector<2x30x224xf32>
    %c0_12 = arith.constant 0 : index
    %c0_13 = arith.constant 0 : index
    %50 = vector.load %arg1[%c0_12, %c0_13] : memref<30x8xf32, #tpu.memory_space<vmem>>, vector<30x8xf32>
    %51 = vector.extract_strided_slice %50 {offsets = [0, 0], sizes = [30, 1], strides = [1, 1]} : vector<30x8xf32> to vector<30x1xf32>
    %52 = vector.shape_cast %51 : vector<30x1xf32> to vector<1x30x1xf32>
    %53 = vector.extract_strided_slice %50 {offsets = [0, 1], sizes = [30, 1], strides = [1, 1]} : vector<30x8xf32> to vector<30x1xf32>
    %54 = vector.shape_cast %53 : vector<30x1xf32> to vector<1x30x1xf32>
    %55 = vector.extract_strided_slice %50 {offsets = [0, 2], sizes = [30, 1], strides = [1, 1]} : vector<30x8xf32> to vector<30x1xf32>
    %56 = vector.shape_cast %55 : vector<30x1xf32> to vector<1x30x1xf32>
    %57 = vector.extract_strided_slice %50 {offsets = [0, 3], sizes = [30, 1], strides = [1, 1]} : vector<30x8xf32> to vector<30x1xf32>
    %58 = vector.shape_cast %57 : vector<30x1xf32> to vector<1x30x1xf32>
    %59 = vector.extract_strided_slice %50 {offsets = [0, 4], sizes = [30, 1], strides = [1, 1]} : vector<30x8xf32> to vector<30x1xf32>
    %60 = vector.shape_cast %59 : vector<30x1xf32> to vector<1x30x1xf32>
    %61 = vector.broadcast %52 : vector<1x30x1xf32> to vector<2x30x224xf32>
    %62 = arith.subf %40, %61 : vector<2x30x224xf32>
    %63 = vector.broadcast %54 : vector<1x30x1xf32> to vector<2x30x224xf32>
    %64 = arith.subf %43, %63 : vector<2x30x224xf32>
    %65 = vector.broadcast %56 : vector<1x30x1xf32> to vector<2x30x224xf32>
    %66 = arith.subf %46, %65 : vector<2x30x224xf32>
    %67 = vector.broadcast %58 : vector<1x30x1xf32> to vector<2x30x224xf32>
    %68 = arith.addf %67, %49 : vector<2x30x224xf32>
    %69 = vector.broadcast %60 : vector<1x30x1xf32> to vector<2x30x224xf32>
    %70 = arith.subf %69, %49 : vector<2x30x224xf32>
    %71 = arith.mulf %62, %62 : vector<2x30x224xf32>
    %72 = arith.mulf %68, %71 : vector<2x30x224xf32>
    %73 = arith.mulf %64, %64 : vector<2x30x224xf32>
    %74 = arith.addf %72, %73 : vector<2x30x224xf32>
    %75 = arith.mulf %66, %66 : vector<2x30x224xf32>
    %76 = arith.mulf %70, %75 : vector<2x30x224xf32>
    %77 = arith.addf %74, %76 : vector<2x30x224xf32>
    %cst_14 = arith.constant 1.70874447E-14 : f32
    %78 = vector.broadcast %cst_14 : f32 to vector<2x30x224xf32>
    %79 = arith.addf %77, %78 : vector<2x30x224xf32>
    %80 = math.sqrt %79 : vector<2x30x224xf32>
    %c0_15 = arith.constant 0 : index
    %c0_16 = arith.constant 0 : index
    %c0_17 = arith.constant 0 : index
    %81 = vector.load %arg3[%c0_15, %c0_16, %c0_17] : memref<2x30x224xf32, #tpu.memory_space<vmem>>, vector<2x30x224xf32>
    tpu.vector_store %arg3[%c0_15, %c0_16, %c0_17], %80 {strides = array<i32>} : memref<2x30x224xf32, #tpu.memory_space<vmem>>, vector<2x30x224xf32>,
    return
  }
  func.func @transform_0(%arg0: i32) -> (i32, i32) {
    %c0_i32 = arith.constant 0 : i32
    %c0_i32_0 = arith.constant 0 : i32
    %c0_i32_1 = arith.constant 0 : i32
    return %c0_i32, %c0_i32_0 : i32, i32
  }
  func.func @transform_1(%arg0: i32) -> (i32, i32) {
    %c0_i32 = arith.constant 0 : i32
    %c0_i32_0 = arith.constant 0 : i32
    return %arg0, %c0_i32 : i32, i32
  }
  func.func @transform_2(%arg0: i32) -> (i32, i32, i32) {
    %c0_i32 = arith.constant 0 : i32
    %c0_i32_0 = arith.constant 0 : i32
    %c0_i32_1 = arith.constant 0 : i32
    return %arg0, %c0_i32, %c0_i32_0 : i32, i32, i32
  }
}

</mosaic_0001>

<bundles_post_ra>
// kernel: tpu_custom_call.1
= control target key start
LH: loop header
LB: loop body
LE: loop exit
PB: predicated region body
PF: predicated region fallthrough
CT: control target
= control target key end

     0   :  { %v703_v2 = vmov 0   ;;  %s704_s13 = smov 112   ;;  %s705_s18 = smov 96   ;;  %v706_v11 = vmov 1   ;;  %v707_v12 = vmov 2   ;;  %v708_v13 = vmov 3   ;;  %s1209_s1 = inlined_call_operand.vmem [shape: f32[2,1152], index: 1, kind: input, shape index: {}]   ;;  %s1210_s0 = inlined_call_operand.vmem [shape: f32[30,8], index: 0, kind: input, shape index: {}]   ;;  %s1211_s2 = inlined_call_operand.vmem [shape: f32[2,30,224], index: 2, kind: output, shape index: {}]  }
   0x1   :  { %v731_v0 = vld [vmem:[%s1209_s1 + $0x6] sm:$0xf]  ;;  %v11_v1 = vld [vmem:[%s1209_s1] sm:$0xf]  ;;  %662 = vset.pattern.permute.xlu1 %v703_v2  ;;  %661 = vset.pattern.permute.xlu0 %v703_v2  ;;  %v740_v3 = vld [vmem:[%s1209_s1 + $0xc] sm:$0xf]  ;;  %v110_v57 = vlaneseq }
   0x2   :  { %46 = vrot.lane.b32.xlu1 %v731_v0, %s704_s13  ;;  %13 = vrot.lane.b32.xlu0 %v11_v1, %s704_s13  ;;  %v20_v4 = vld [vmem:[%s1209_s1] sm:$0x3f]  ;;  %v81_v5 = vld [vmem:[%s1209_s1 + $0xc] sm:$0x3f]  ;;  %v709_v14 = vmov 4   ;;  %vm16_vm0 = vcmask 916480  }
   0x3   :  { %v52_v6 = vld [vmem:[%s1209_s1 + $0x6] sm:$0x3f]  ;;  %v767_v9 = vld [vmem:[%s1210_s0 + $0x10] sm:$0xff]  ;;  %v772_v10 = vld [vmem:[%s1210_s0 + $0x18] sm:$0x3f]  ;;  %vm25_vm1 = vcmask 785408  }
   0x4   :  { %v755_v7 = vld [vmem:[%s1210_s0 + $0x8] sm:$0xff]  ;;  %v760_v8 = vld [vmem:[%s1210_s0] sm:$0xff]  ;;  %s710_s0 = smov 126   ;;  %s711_s30 = smov 127   ;;  %v712_v55 = vmov 1966171168  }
   0x5   :  { %v108_v56 = vunpack.c.l.s4 %v712_v55  ;;  %vm33_vm2 = vcmask 1039360   ;;  %vm40_vm3 = vcmask 1031168   ;;  %v111_v63 = vshrl.u32 %v110_v57, 7 }
   0x6   :  { %75 = vrot.lane.b32.xlu1 %v740_v3, %s704_s13  ;;  %22 = vrot.lane.b32.xlu0 %v20_v4, %s705_s18 }
   0x7   :  { %v109_v62 = vunpack.c.0.s8 %v108_v56 }
   0xa   :  { %83 = vrot.lane.b32.xlu1 %v81_v5, %s705_s18  ;;  %54 = vrot.lane.b32.xlu0 %v52_v6, %s705_s18 }
   0xe   :  { %233 = vperm.xlu1 %662, %v755_v7   ;;  %228 = vperm.xlu0 %661, %v760_v8  }
  0x12   :  { %238 = vperm.xlu1 %662, %v767_v9   ;;  %243 = vperm.xlu0 %661, %v772_v10  }
  0x16   :  { %663 = vset.pattern.permute.xlu1 %v706_v11  ;;  %664 = vset.pattern.permute.xlu0 %v706_v11 }
  0x17   :  { %263 = vperm.xlu1 %663, %v760_v8   ;;  %267 = vperm.xlu0 %664, %v755_v7  }
  0x1b   :  { %271 = vperm.xlu1 %663, %v767_v9   ;;  %665 = vset.pattern.permute.xlu0 %v707_v12 }
  0x1c   :  { %295 = vperm.xlu0 %665, %v760_v8  }
  0x1f   :  { %275 = vperm.xlu1 %663, %v772_v10  }
  0x20   :  { %307 = vperm.xlu0 %665, %v772_v10  }
  0x23   :  { %666 = vset.pattern.permute.xlu1 %v707_v12 }
  0x24   :  { %299 = vperm.xlu1 %666, %v755_v7   ;;  %668 = vset.pattern.permute.xlu0 %v708_v13 }
  0x25   :  { %331 = vperm.xlu0 %668, %v755_v7  }
  0x28   :  { %303 = vperm.xlu1 %666, %v767_v9  }
  0x29   :  { %669 = vset.pattern.permute.xlu0 %v709_v14 }
  0x2c   :  { %667 = vset.pattern.permute.xlu1 %v708_v13 }
  0x2d   :  { %327 = vperm.xlu1 %667, %v760_v8  }
  0x31   :  { %335 = vperm.xlu1 %667, %v767_v9  }
  0x35   :  { %339 = vperm.xlu1 %667, %v772_v10  }
  0x39   :  { %670 = vset.pattern.permute.xlu1 %v709_v14 }
  0x74   :  { %v47_v15 = vpop.permute.xlu1 %46  ;;  %v14_v16 = vpop.permute.xlu0 %13 }
  0x75   :  { %v15_v17 = vrot.slane %v14_v16, 2  ;;  %v48_v18 = vrot.slane %v47_v15, 2 }
  0x77   :  { %v17_v19 = vsel %vm16_vm0, %v14_v16, %v15_v17  ;;  %v49_v25 = vsel %vm16_vm0, %v47_v15, %v48_v18 }
  0x78   :  { %v76_v20 = vpop.permute.xlu1 %75  ;;  %v23_v21 = vpop.permute.xlu0 %22  ;;  %v19_v24 = vadd.f32 %v17_v19, %v11_v1  ;;  %v51_v33 = vadd.f32 %v49_v25, %v731_v0 }
  0x79   :  { %v77_v22 = vrot.slane %v76_v20, 2  ;;  %v24_v23 = vrot.slane %v23_v21, 2 }
  0x7b   :  { %v78_v26 = vsel %vm16_vm0, %v76_v20, %v77_v22  ;;  %v26_v27 = vsel %vm25_vm1, %v23_v21, %v24_v23 }
  0x7c   :  { %v28_v28 = vadd.f32 %v26_v27, %v19_v24  ;;  %v84_v29 = vpop.permute.xlu1 %83  ;;  %v55_v30 = vpop.permute.xlu0 %54  ;;  %v80_v34 = vadd.f32 %v78_v26, %v740_v3 }
  0x7d   :  { %v85_v31 = vrot.slane %v84_v29, 2  ;;  %v56_v32 = vrot.slane %v55_v30, 2 }
  0x7e   :  { %37 = vrot.lane.b32.xlu1 %v28_v28, %s710_s0  ;;  %30 = vrot.lane.b32.xlu0 %v28_v28, %s711_s30 }
  0x7f   :  { %v86_v35 = vsel %vm25_vm1, %v84_v29, %v85_v31  ;;  %v57_v36 = vsel %vm25_vm1, %v55_v30, %v56_v32 }
  0x80   :  { %v88_v37 = vadd.f32 %v86_v35, %v80_v34  ;;  %v59_v38 = vadd.f32 %v57_v36, %v51_v33 }
  0x82   :  { %90 = vrot.lane.b32.xlu1 %v88_v37, %s711_s30  ;;  %61 = vrot.lane.b32.xlu0 %v59_v38, %s711_s30 }
  0x86   :  { %96 = vrot.lane.b32.xlu1 %v88_v37, %s710_s0  ;;  %67 = vrot.lane.b32.xlu0 %v59_v38, %s710_s0 }
  0x8a   :  { %363 = vperm.xlu1 %670, %v755_v7   ;;  %359 = vperm.xlu0 %669, %v760_v8   ;;  %v112_v7 = vsub.s32 %v109_v62, %v111_v63 }
  0x8d   :  { %v797_v39 = vpop.permute.xlu1 %233  ;;  %v805_v43 = vpop.permute.xlu0 %228 }
  0x8e   :  { %367 = vperm.xlu1 %670, %v767_v9   ;;  %371 = vperm.xlu0 %669, %v772_v10   ;;  %v117_v9 = vsub.s32 0, %v111_v63  ;;  %v121_v10 = vsub.s32 1, %v111_v63 }
  0x91   :  { %v799_v40 = vpop.permute.xlu1 %238  ;;  %v809_v45 = vpop.permute.xlu0 %243 }
  0x96   :  { %v801_v41 = vpop.permute.xlu1 %263  ;;  %v813_v47 = vpop.permute.xlu0 %267 }
  0x9a   :  { %v803_v42 = vpop.permute.xlu1 %271 }
  0x9b   :  { %v817_v49 = vpop.permute.xlu0 %295 }
  0x9e   :  { %v807_v44 = vpop.permute.xlu1 %275 }
  0x9f   :  { %v821_v51 = vpop.permute.xlu0 %307 }
  0xa3   :  { %v811_v46 = vpop.permute.xlu1 %299 }
  0xa4   :  { %v332_v53 = vpop.permute.xlu0 %331 }
  0xa7   :  { %v815_v48 = vpop.permute.xlu1 %303 }
  0xac   :  { %v819_v50 = vpop.permute.xlu1 %327 }
  0xb0   :  { %v823_v52 = vpop.permute.xlu1 %335 }
  0xb4   :  { %v825_v54 = vpop.permute.xlu1 %339 }
  0xf0   :  { %v38_v58 = vpop.permute.xlu1 %37  ;;  %v31_v59 = vpop.permute.xlu0 %30 }
  0xf1   :  { %v39_v60 = vrot.slane %v38_v58, 2  ;;  %v32_v61 = vrot.slane %v31_v59, 2 }
  0xf3   :  { %v34_v0 = vsel %vm33_vm2, %v31_v59, %v32_v61  ;;  %v41_v4 = vsel %vm40_vm3, %v38_v58, %v39_v60 }
  0xf4   :  { %v36_v1 = vadd.f32 %v34_v0, %v28_v28  ;;  %v91_v2 = vpop.permute.xlu1 %90  ;;  %v62_v3 = vpop.permute.xlu0 %61 }
  0xf5   :  { %v92_v5 = vrot.slane %v91_v2, 2  ;;  %v63_v6 = vrot.slane %v62_v3, 2 }
  0xf6   :  { %v43_v8 = vadd.f32 %v41_v4, %v36_v1 }
  0xf7   :  { %v93_v13 = vsel %vm33_vm2, %v91_v2, %v92_v5  ;;  %v64_v14 = vsel %vm33_vm2, %v62_v3, %v63_v6 }
  0xf8   :  { %v102_v11 = vmul.f32 28.333334, %v43_v8  ;;  %v105_v12 = vmul.f32 9.4559425e-08, %v43_v8  ;;  %v97_v15 = vpop.permute.xlu1 %96  ;;  %v68_v16 = vpop.permute.xlu0 %67  ;;  %v95_v21 = vadd.f32 %v93_v13, %v88_v37  ;;  %v66_v22 = vadd.f32 %v64_v14, %v59_v38 }
  0xf9   :  { %v98_v17 = vrot.slane %v97_v15, 2  ;;  %v69_v18 = vrot.slane %v68_v16, 2 }
  0xfa   :  { %v113_v19 = vrot.slane %v102_v11, %v112_v7  ;;  %v200_v20 = vrot.slane %v105_v12, %v112_v7 }
  0xfb   :  { %v99_v23 = vsel %vm40_vm3, %v97_v15, %v98_v17  ;;  %v70_v24 = vsel %vm40_vm3, %v68_v16, %v69_v18 }
  0xfc   :  { %v114_v25 = vcombine.high %v113_v19, %v113_v19  ;;  %v833_v26 = vrot.slane %v113_v19, %v117_v9  ;;  %v835_v27 = vrot.slane %v113_v19, %v121_v10  ;;  %v201_v28 = vcombine.high %v200_v20, %v200_v20 }
  0xfd   :  { %v837_v29 = vrot.slane %v200_v20, %v117_v9  ;;  %v839_v30 = vrot.slane %v200_v20, %v121_v10  ;;  %v101_v31 = vadd.f32 %v99_v23, %v95_v21  ;;  %v72_v32 = vadd.f32 %v70_v24, %v66_v22 }
  0xfe   :  { %v841_v33 = vrot.slane %v114_v25, %v117_v9  ;;  %v843_v34 = vrot.slane %v114_v25, %v121_v10  ;;  %v845_v35 = vrot.slane %v201_v28, %v117_v9  ;;  %v847_v36 = vrot.slane %v201_v28, %v121_v10 }
  0xff   :  { %v104_v37 = vmul.f32 28.333334, %v101_v31  ;;  %v103_v38 = vmul.f32 0.074074075, %v72_v32  ;;  %v248_v55 = vsub.f32 %v833_v26, %v797_v39  ;;  %v249_v56 = vsub.f32 %v835_v27, %v797_v39 }
 0x100   :  { %v256_v57 = vsub.f32 %v841_v33, %v797_v39  ;;  %v257_v58 = vsub.f32 %v843_v34, %v797_v39  ;;  %v344_v59 = vadd.f32 %v332_v53, %v837_v29  ;;  %v345_v60 = vadd.f32 %v332_v53, %v839_v30 }
 0x101   :  { %v171_v61 = vrot.slane %v104_v37, %v112_v7  ;;  %v142_v62 = vrot.slane %v103_v38, %v112_v7  ;;  %v352_v63 = vadd.f32 %v332_v53, %v845_v35  ;;  %v353_v0 = vadd.f32 %v332_v53, %v847_v36 }
 0x102   :  { %v392_v1 = vmul.f32 %v248_v55, %v248_v55  ;;  %v393_v2 = vmul.f32 %v249_v56, %v249_v56  ;;  %v400_v3 = vmul.f32 %v256_v57, %v256_v57  ;;  %v401_v4 = vmul.f32 %v257_v58, %v257_v58 }
 0x103   :  { %v172_v5 = vcombine.high %v171_v61, %v171_v61  ;;  %v861_v6 = vrot.slane %v171_v61, %v117_v9  ;;  %v863_v8 = vrot.slane %v171_v61, %v121_v10  ;;  %v143_v39 = vcombine.high %v142_v62, %v142_v62 }
 0x104   :  { %v865_v11 = vrot.slane %v142_v62, %v117_v9  ;;  %v867_v12 = vrot.slane %v142_v62, %v121_v10  ;;  %v408_v13 = vmul.f32 %v392_v1, %v344_v59  ;;  %v409_v7 = vmul.f32 %v393_v2, %v345_v60 }
 0x105   :  { %v869_v14 = vrot.slane %v172_v5, %v117_v9  ;;  %v871_v15 = vrot.slane %v172_v5, %v121_v10  ;;  %v873_v53 = vrot.slane %v143_v39, %v117_v9  ;;  %v875_v16 = vrot.slane %v143_v39, %v121_v10 }
 0x106   :  { %v312_v17 = vsub.f32 %v861_v6, %v811_v46  ;;  %v313_v18 = vsub.f32 %v863_v8, %v811_v46  ;;  %v280_v19 = vsub.f32 %v865_v11, %v813_v47  ;;  %v281_v20 = vsub.f32 %v867_v12, %v813_v47 }
 0x107   :  { %v320_v21 = vsub.f32 %v869_v14, %v811_v46  ;;  %v321_v9 = vsub.f32 %v871_v15, %v811_v46  ;;  %v288_v10 = vsub.f32 %v873_v53, %v813_v47  ;;  %v289_v22 = vsub.f32 %v875_v16, %v813_v47 }
 0x108   :  { %v456_v23 = vmul.f32 %v312_v17, %v312_v17  ;;  %v457_v24 = vmul.f32 %v313_v18, %v313_v18  ;;  %v416_v25 = vmul.f32 %v400_v3, %v352_v63  ;;  %v417_v28 = vmul.f32 %v401_v4, %v353_v0 }
 0x109   :  { %v464_v31 = vmul.f32 %v320_v21, %v320_v21  ;;  %v465_v32 = vmul.f32 %v321_v9, %v321_v9  ;;  %v364_v37 = vpop.permute.xlu1 %363  ;;  %v424_v38 = vmul.f32 %v280_v19, %v280_v19  ;;  %v425_v55 = vmul.f32 %v281_v20, %v281_v20 }
 0x10a   :  { %v376_v56 = vsub.f32 %v364_v37, %v837_v29  ;;  %v377_v57 = vsub.f32 %v364_v37, %v839_v30  ;;  %v384_v46 = vsub.f32 %v364_v37, %v845_v35  ;;  %v385_v58 = vsub.f32 %v364_v37, %v847_v36 }
 0x10b   :  { %v432_v59 = vmul.f32 %v288_v10, %v288_v10  ;;  %v433_v60 = vmul.f32 %v289_v22, %v289_v22  ;;  %v440_v47 = vadd.f32 %v424_v38, %v408_v13  ;;  %v441_v61 = vadd.f32 %v425_v55, %v409_v7 }
 0x10c   :  { %v472_v62 = vmul.f32 %v456_v23, %v376_v56  ;;  %v473_v63 = vmul.f32 %v457_v24, %v377_v57  ;;  %v480_v0 = vmul.f32 %v464_v31, %v384_v46  ;;  %v481_v1 = vmul.f32 %v465_v32, %v385_v58 }
 0x10d   :  { %v448_v2 = vadd.f32 %v432_v59, %v416_v25  ;;  %v449_v3 = vadd.f32 %v433_v60, %v417_v28  ;;  %v246_v13 = vsub.f32 %v833_v26, %v805_v43  ;;  %v247_v7 = vsub.f32 %v835_v27, %v805_v43 }
 0x10e   :  { %v488_v4 = vadd.f32 %v472_v62, %v440_v47  ;;  %v489_v5 = vadd.f32 %v473_v63, %v441_v61  ;;  %v254_v9 = vsub.f32 %v841_v33, %v805_v43  ;;  %v255_v10 = vsub.f32 %v843_v34, %v805_v43 }
 0x10f   :  { %v496_v39 = vadd.f32 %v480_v0, %v448_v2  ;;  %v497_v17 = vadd.f32 %v481_v1, %v449_v3  ;;  %v278_v22 = vsub.f32 %v865_v11, %v801_v41  ;;  %v279_v23 = vsub.f32 %v867_v12, %v801_v41  ;;  %v360_v1 = vpop.permute.xlu0 %359 }
 0x110   :  { %v897_v18 = vadd.f32 1.7087445e-14, %v488_v4  ;;  %v899_v19 = vadd.f32 1.7087445e-14, %v489_v5  ;;  %v286_v24 = vsub.f32 %v873_v53, %v801_v41  ;;  %v287_v25 = vsub.f32 %v875_v16, %v801_v41 }
 0x111   :  { %v901_v20 = vadd.f32 1.7087445e-14, %v496_v39  ;;  %v903_v21 = vadd.f32 1.7087445e-14, %v497_v17  ;;  %v310_v28 = vsub.f32 %v861_v6, %v817_v49  ;;  %v311_v43 = vsub.f32 %v863_v8, %v817_v49 }
 0x112   :  { %671 = vrsqrt.f32 %v897_v18  ;;  %v537_v31 = vand.u32 2147483648, %v897_v18  ;;  %v544_v32 = vand.u32 2147483648, %v899_v19  ;;  %vm534_vm4 = vcmp.eq.f32.partialorder %v897_v18, inf }
 0x113   :  { %673 = vrsqrt.f32 %v899_v19  ;;  %v593_v37 = vand.u32 2147483648, %v901_v20  ;;  %v318_v38 = vsub.f32 %v869_v14, %v817_v49  ;;  %v319_v41 = vsub.f32 %v871_v15, %v817_v49 }
 0x114   :  { %675 = vrsqrt.f32 %v901_v20  ;;  %v342_v55 = vadd.f32 %v819_v50, %v837_v29  ;;  %v343_v56 = vadd.f32 %v819_v50, %v839_v30  ;;  %vm536_vm5 = vcmp.eq.f32.partialorder %v897_v18, 0.0 }
 0x115   :  { %677 = vrsqrt.f32 %v903_v21  ;;  %vm541_vm6 = vcmp.eq.f32.partialorder %v899_v19, inf  ;;  %v350_v57 = vadd.f32 %v819_v50, %v845_v35  ;;  %v351_v46 = vadd.f32 %v819_v50, %v847_v36 }
 0x116   :  { %v390_v58 = vmul.f32 %v246_v13, %v246_v13  ;;  %v391_v59 = vmul.f32 %v247_v7, %v247_v7  ;;  %vm543_vm7 = vcmp.eq.f32.partialorder %v899_v19, 0.0  ;;  %vm590_vm8 = vcmp.eq.f32.partialorder %v901_v20, inf }
 0x117   :  { %v398_v49 = vmul.f32 %v254_v9, %v254_v9  ;;  %v399_v60 = vmul.f32 %v255_v10, %v255_v10  ;;  %v422_v47 = vmul.f32 %v278_v22, %v278_v22  ;;  %v423_v61 = vmul.f32 %v279_v23, %v279_v23 }
 0x118   :  { %vm592_vm9 = vcmp.eq.f32.partialorder %v901_v20, 0.0  ;;  %vm597_vm10 = vcmp.eq.f32.partialorder %v903_v21, inf  ;;  %v406_v62 = vmul.f32 %v390_v58, %v342_v55  ;;  %v407_v63 = vmul.f32 %v391_v59, %v343_v56 }
 0x119   :  { %v430_v0 = vmul.f32 %v286_v24, %v286_v24  ;;  %vm599_vm11 = vcmp.eq.f32.partialorder %v903_v21, 0.0  ;;  %v600_v50 = vand.u32 2147483648, %v903_v21  ;;  %v414_v2 = vmul.f32 %v398_v49, %v350_v57 }
 0x11a   :  { %v415_v3 = vmul.f32 %v399_v60, %v351_v46  ;;  %v431_v4 = vmul.f32 %v287_v25, %v287_v25  ;;  %v438_v5 = vadd.f32 %v422_v47, %v406_v62  ;;  %v439_v39 = vadd.f32 %v423_v61, %v407_v63 }
 0x11b   :  { %v454_v17 = vmul.f32 %v310_v28, %v310_v28  ;;  %v455_v13 = vmul.f32 %v311_v43, %v311_v43  ;;  %v462_v9 = vmul.f32 %v318_v38, %v318_v38  ;;  %v463_v10 = vmul.f32 %v319_v41, %v319_v41 }
 0x11c   :  { %v672_v7 = vpop.eup %671  ;;  %v374_v22 = vsub.f32 %v360_v1, %v837_v29  ;;  %v375_v23 = vsub.f32 %v360_v1, %v839_v30  ;;  %v446_v56 = vadd.f32 %v430_v0, %v414_v2  ;;  %v382_v58 = vsub.f32 %v360_v1, %v845_v35 }
 0x11d   :  { %v674_v24 = vpop.eup %673  ;;  %v533_v55 = vmul.f32 %v672_v7, %v897_v18  ;;  %v383_v57 = vsub.f32 %v360_v1, %v847_v36  ;;  %v447_v28 = vadd.f32 %v431_v4, %v415_v3 }
 0x11e   :  { %v676_v25 = vpop.eup %675  ;;  %v540_v46 = vmul.f32 %v674_v24, %v899_v19  ;;  %v470_v43 = vmul.f32 %v454_v17, %v374_v22  ;;  %v471_v59 = vmul.f32 %v455_v13, %v375_v23  ;;  %v478_v60 = vmul.f32 %v462_v9, %v382_v58 }
 0x11f   :  { %v678_v38 = vpop.eup %677  ;;  %v535_v41 = vsel %vm534_vm4, %v897_v18, %v533_v55  ;;  %v589_v49 = vmul.f32 %v676_v25, %v901_v20  ;;  %v479_v47 = vmul.f32 %v463_v10, %v383_v57  ;;  %v322_v17 = vsub.f32 %v869_v14, %v815_v48 }
 0x120   :  { %v538_v61 = vsel %vm536_vm5, %v537_v31, %v535_v41  ;;  %v542_v62 = vsel %vm541_vm6, %v899_v19, %v540_v46  ;;  %v596_v63 = vmul.f32 %v678_v38, %v903_v21  ;;  %v486_v0 = vadd.f32 %v470_v43, %v438_v5 }
 0x121   :  { %v545_v1 = vsel %vm543_vm7, %v544_v32, %v542_v62  ;;  %v591_v2 = vsel %vm590_vm8, %v901_v20, %v589_v49  ;;  %632 = vst [vmem:[%s1211_s2 + $0x10] sm:$0xff] %v538_v61  ;;  %v487_v18 = vadd.f32 %v471_v59, %v439_v39  ;;  %v494_v31 = vadd.f32 %v478_v60, %v446_v56  ;;  %v368_v56 = vpop.permute.xlu1 %367 }
 0x122   :  { %v594_v3 = vsel %vm592_vm9, %v593_v37, %v591_v2  ;;  %v598_v19 = vsel %vm597_vm10, %v903_v21, %v596_v63  ;;  %633 = vst.msk [vmem:[%s1211_s2 + $0x18] sm:$0xff] %vm25_vm1, %v545_v1  ;;  %v495_v32 = vadd.f32 %v479_v47, %v447_v28  ;;  %v988_v4 = vadd.f32 1.7087445e-14, %v486_v0 }
 0x123   :  { %v601_v5 = vsel %vm599_vm11, %v600_v50, %v598_v19  ;;  %641 = vst [vmem:[%s1211_s2 + $0x50] sm:$0xff] %v594_v3  ;;  %v995_v20 = vadd.f32 1.7087445e-14, %v487_v18  ;;  %v997_v37 = vadd.f32 1.7087445e-14, %v494_v31  ;;  %v314_v21 = vsub.f32 %v861_v6, %v815_v48 }
 0x124   :  { %642 = vst.msk [vmem:[%s1211_s2 + $0x58] sm:$0xff] %vm25_vm1, %v601_v5  ;;  %v1003_v39 = vadd.f32 1.7087445e-14, %v495_v32  ;;  %679 = vrsqrt.f32 %v988_v4  ;;  %v315_v50 = vsub.f32 %v863_v8, %v815_v48  ;;  %v523_v13 = vand.u32 2147483648, %v988_v4 }
 0x125   :  { %681 = vrsqrt.f32 %v995_v20  ;;  %v530_v7 = vand.u32 2147483648, %v995_v20  ;;  %vm520_vm12 = vcmp.eq.f32.partialorder %v988_v4, inf  ;;  %v579_v9 = vand.u32 2147483648, %v997_v37 }
 0x126   :  { %683 = vrsqrt.f32 %v997_v37  ;;  %v323_v22 = vsub.f32 %v871_v15, %v815_v48  ;;  %v458_v23 = vmul.f32 %v314_v21, %v314_v21  ;;  %vm522_vm13 = vcmp.eq.f32.partialorder %v988_v4, 0.0 }
 0x127   :  { %685 = vrsqrt.f32 %v1003_v39  ;;  %vm527_vm14 = vcmp.eq.f32.partialorder %v995_v20, inf  ;;  %v459_v24 = vmul.f32 %v315_v50, %v315_v50  ;;  %v466_v55 = vmul.f32 %v322_v17, %v322_v17 }
 0x128   :  { %v250_v58 = vsub.f32 %v833_v26, %v799_v40  ;;  %v251_v57 = vsub.f32 %v835_v27, %v799_v40  ;;  %vm529_vm15 = vcmp.eq.f32.partialorder %v995_v20, 0.0  ;;  %vm576_vm0 = vcmp.eq.f32.partialorder %v997_v37, inf }
 0x129   :  { %v258_v48 = vsub.f32 %v841_v33, %v799_v40  ;;  %v259_v25 = vsub.f32 %v843_v34, %v799_v40  ;;  %v282_v46 = vsub.f32 %v865_v11, %v803_v42  ;;  %v283_v28 = vsub.f32 %v867_v12, %v803_v42 }
 0x12a   :  { %vm578_vm2 = vcmp.eq.f32.partialorder %v997_v37, 0.0  ;;  %vm583_vm3 = vcmp.eq.f32.partialorder %v1003_v39, inf  ;;  %v467_v43 = vmul.f32 %v323_v22, %v323_v22  ;;  %v290_v59 = vsub.f32 %v873_v53, %v803_v42 }
 0x12b   :  { %v291_v38 = vsub.f32 %v875_v16, %v803_v42  ;;  %v346_v40 = vadd.f32 %v823_v52, %v837_v29  ;;  %vm585_vm4 = vcmp.eq.f32.partialorder %v1003_v39, 0.0  ;;  %v347_v41 = vadd.f32 %v823_v52, %v839_v30 }
 0x12c   :  { %v354_v49 = vadd.f32 %v823_v52, %v845_v35  ;;  %v355_v60 = vadd.f32 %v823_v52, %v847_v36  ;;  %v378_v47 = vsub.f32 %v368_v56, %v837_v29  ;;  %v379_v61 = vsub.f32 %v368_v56, %v839_v30 }
 0x12d   :  { %v386_v42 = vsub.f32 %v368_v56, %v845_v35  ;;  %v394_v62 = vmul.f32 %v250_v58, %v250_v58  ;;  %v395_v63 = vmul.f32 %v251_v57, %v251_v57  ;;  %v402_v1 = vmul.f32 %v258_v48, %v258_v48 }
 0x12e   :  { %v680_v0 = vpop.eup %679  ;;  %v403_v2 = vmul.f32 %v259_v25, %v259_v25  ;;  %v426_v18 = vmul.f32 %v282_v46, %v282_v46  ;;  %v427_v31 = vmul.f32 %v283_v28, %v283_v28  ;;  %v387_v32 = vsub.f32 %v368_v56, %v847_v36 }
 0x12f   :  { %v682_v3 = vpop.eup %681  ;;  %v519_v19 = vmul.f32 %v680_v0, %v988_v4  ;;  %v410_v5 = vmul.f32 %v394_v62, %v346_v40  ;;  %v434_v52 = vmul.f32 %v290_v59, %v290_v59  ;;  %v411_v17 = vmul.f32 %v395_v63, %v347_v41 }
 0x130   :  { %v684_v21 = vpop.eup %683  ;;  %v526_v50 = vmul.f32 %v682_v3, %v995_v20  ;;  %v418_v22 = vmul.f32 %v402_v1, %v354_v49  ;;  %v419_v10 = vmul.f32 %v403_v2, %v355_v60  ;;  %v435_v25 = vmul.f32 %v291_v38, %v291_v38 }
 0x131   :  { %v686_v58 = vpop.eup %685  ;;  %v521_v57 = vsel %vm520_vm12, %v988_v4, %v519_v19  ;;  %v575_v48 = vmul.f32 %v684_v21, %v997_v37  ;;  %v442_v46 = vadd.f32 %v426_v18, %v410_v5  ;;  %v443_v40 = vadd.f32 %v427_v31, %v411_v17 }
 0x132   :  { %v524_v56 = vsel %vm522_vm13, %v523_v13, %v521_v57  ;;  %v528_v28 = vsel %vm527_vm14, %v995_v20, %v526_v50  ;;  %v582_v59 = vmul.f32 %v686_v58, %v1003_v39  ;;  %v450_v4 = vadd.f32 %v434_v52, %v418_v22  ;;  %v372_v22 = vpop.permute.xlu0 %371 }
 0x133   :  { %v531_v41 = vsel %vm529_vm15, %v530_v7, %v528_v28  ;;  %v577_v49 = vsel %vm576_vm0, %v997_v37, %v575_v48  ;;  %630 = vst [vmem:[%s1211_s2] sm:$0xff] %v524_v56  ;;  %v474_v13 = vmul.f32 %v458_v23, %v378_v47  ;;  %v475_v20 = vmul.f32 %v459_v24, %v379_v61 }
 0x134   :  { %v580_v38 = vsel %vm578_vm2, %v579_v9, %v577_v49  ;;  %v584_v60 = vsel %vm583_vm3, %v1003_v39, %v582_v59  ;;  %631 = vst.msk [vmem:[%s1211_s2 + $0x8] sm:$0xff] %vm25_vm1, %v531_v41  ;;  %v482_v7 = vmul.f32 %v466_v55, %v386_v42  ;;  %v1212_v62 = vand.u32 2147483648, %v1003_v39 }
 0x135   :  { %639 = vst [vmem:[%s1211_s2 + $0x40] sm:$0xff] %v580_v38  ;;  %v451_v37 = vadd.f32 %v435_v25, %v419_v10  ;;  %v483_v9 = vmul.f32 %v467_v43, %v387_v32  ;;  %v490_v23 = vadd.f32 %v474_v13, %v442_v46  ;;  %v491_v47 = vadd.f32 %v475_v20, %v443_v40 }
 0x136   :  { %v587_v63 = vsel %vm585_vm4, %v1212_v62, %v584_v60  ;;  %v498_v24 = vadd.f32 %v482_v7, %v450_v4  ;;  %v252_v10 = vsub.f32 %v833_v26, %v809_v45  ;;  %v253_v43 = vsub.f32 %v835_v27, %v809_v45 }
 0x137   :  { %640 = vst.msk [vmem:[%s1211_s2 + $0x48] sm:$0xff] %vm25_vm1, %v587_v63  ;;  %v499_v55 = vadd.f32 %v483_v9, %v451_v37  ;;  %v1097_v61 = vadd.f32 1.7087445e-14, %v490_v23  ;;  %v1099_v42 = vadd.f32 1.7087445e-14, %v491_v47  ;;  %v260_v1 = vsub.f32 %v841_v33, %v809_v45 }
 0x138   :  { %v1101_v39 = vadd.f32 1.7087445e-14, %v498_v24  ;;  %v261_v2 = vsub.f32 %v843_v34, %v809_v45  ;;  %v284_v18 = vsub.f32 %v865_v11, %v807_v44  ;;  %v285_v31 = vsub.f32 %v867_v12, %v807_v44 }
 0x139   :  { %v1103_v0 = vadd.f32 1.7087445e-14, %v499_v55  ;;  %687 = vrsqrt.f32 %v1097_v61  ;;  %v551_v3 = vand.u32 2147483648, %v1097_v61  ;;  %v558_v26 = vand.u32 2147483648, %v1099_v42 }
 0x13a   :  { %689 = vrsqrt.f32 %v1099_v42  ;;  %v292_v27 = vsub.f32 %v873_v53, %v807_v44  ;;  %vm548_vm5 = vcmp.eq.f32.partialorder %v1097_v61, inf  ;;  %v607_v33 = vand.u32 2147483648, %v1101_v39 }
 0x13b   :  { %691 = vrsqrt.f32 %v1101_v39  ;;  %v293_v45 = vsub.f32 %v875_v16, %v807_v44  ;;  %v316_v34 = vsub.f32 %v861_v6, %v821_v51  ;;  %v317_v11 = vsub.f32 %v863_v8, %v821_v51 }
 0x13c   :  { %693 = vrsqrt.f32 %v1103_v0  ;;  %vm550_vm6 = vcmp.eq.f32.partialorder %v1097_v61, 0.0  ;;  %vm555_vm7 = vcmp.eq.f32.partialorder %v1099_v42, inf  ;;  %v324_v12 = vsub.f32 %v869_v14, %v821_v51 }
 0x13d   :  { %v325_v53 = vsub.f32 %v871_v15, %v821_v51  ;;  %v348_v19 = vadd.f32 %v825_v54, %v837_v29  ;;  %v349_v44 = vadd.f32 %v825_v54, %v839_v30  ;;  %vm557_vm8 = vcmp.eq.f32.partialorder %v1099_v42, 0.0 }
 0x13e   :  { %vm604_vm9 = vcmp.eq.f32.partialorder %v1101_v39, inf  ;;  %v356_v6 = vadd.f32 %v825_v54, %v845_v35  ;;  %v357_v8 = vadd.f32 %v825_v54, %v847_v36  ;;  %v396_v14 = vmul.f32 %v252_v10, %v252_v10 }
 0x13f   :  { %v397_v16 = vmul.f32 %v253_v43, %v253_v43  ;;  %vm606_vm10 = vcmp.eq.f32.partialorder %v1101_v39, 0.0  ;;  %vm611_vm11 = vcmp.eq.f32.partialorder %v1103_v0, inf  ;;  %v404_v51 = vmul.f32 %v260_v1, %v260_v1 }
 0x140   :  { %v405_v15 = vmul.f32 %v261_v2, %v261_v2  ;;  %v428_v32 = vmul.f32 %v284_v18, %v284_v18  ;;  %v429_v5 = vmul.f32 %v285_v31, %v285_v31  ;;  %vm613_vm12 = vcmp.eq.f32.partialorder %v1103_v0, 0.0 }
 0x141   :  { %v614_v52 = vand.u32 2147483648, %v1103_v0  ;;  %v412_v21 = vmul.f32 %v396_v14, %v348_v19  ;;  %v413_v50 = vmul.f32 %v397_v16, %v349_v44  ;;  %v436_v17 = vmul.f32 %v292_v27, %v292_v27 }
 0x142   :  { %v420_v58 = vmul.f32 %v404_v51, %v356_v6  ;;  %v421_v54 = vmul.f32 %v405_v15, %v357_v8  ;;  %v437_v57 = vmul.f32 %v293_v45, %v293_v45  ;;  %v460_v48 = vmul.f32 %v316_v34, %v316_v34 }
 0x143   :  { %v688_v25 = vpop.eup %687  ;;  %v444_v46 = vadd.f32 %v428_v32, %v412_v21  ;;  %v445_v56 = vadd.f32 %v429_v5, %v413_v50  ;;  %v461_v28 = vmul.f32 %v317_v11, %v317_v11  ;;  %v468_v59 = vmul.f32 %v324_v12, %v324_v12 }
 0x144   :  { %v690_v40 = vpop.eup %689  ;;  %v547_v41 = vmul.f32 %v688_v25, %v1097_v61  ;;  %v452_v49 = vadd.f32 %v436_v17, %v420_v58  ;;  %v469_v4 = vmul.f32 %v325_v53, %v325_v53  ;;  %v380_v13 = vsub.f32 %v372_v22, %v837_v29 }
 0x145   :  { %v692_v38 = vpop.eup %691  ;;  %v554_v60 = vmul.f32 %v690_v40, %v1099_v42  ;;  %v381_v20 = vsub.f32 %v372_v22, %v839_v30  ;;  %v388_v7 = vsub.f32 %v372_v22, %v845_v35  ;;  %v389_v62 = vsub.f32 %v372_v22, %v847_v36 }
 0x146   :  { %v694_v63 = vpop.eup %693  ;;  %v549_v37 = vsel %vm548_vm5, %v1097_v61, %v547_v41  ;;  %v603_v9 = vmul.f32 %v692_v38, %v1101_v39  ;;  %v453_v23 = vadd.f32 %v437_v57, %v421_v54  ;;  %v476_v47 = vmul.f32 %v460_v48, %v380_v13 }
 0x147   :  { %v552_v29 = vsel %vm550_vm6, %v551_v3, %v549_v37  ;;  %v556_v30 = vsel %vm555_vm7, %v1099_v42, %v554_v60  ;;  %v610_v35 = vmul.f32 %v694_v63, %v1103_v0  ;;  %v477_v24 = vmul.f32 %v461_v28, %v381_v20 }
 0x148   :  { %v559_v36 = vsel %vm557_vm8, %v558_v26, %v556_v30  ;;  %v605_v55 = vsel %vm604_vm9, %v1101_v39, %v603_v9  ;;  %634 = vst [vmem:[%s1211_s2 + $0x20] sm:$0xff] %v552_v29  ;;  %v484_v61 = vmul.f32 %v468_v59, %v388_v7  ;;  %v485_v10 = vmul.f32 %v469_v4, %v389_v62 }
 0x149   :  { %v608_v43 = vsel %vm606_vm10, %v607_v33, %v605_v55  ;;  %v612_v1 = vsel %vm611_vm11, %v1103_v0, %v610_v35  ;;  %635 = vst.msk [vmem:[%s1211_s2 + $0x28] sm:$0xff] %vm25_vm1, %v559_v36  ;;  %v492_v42 = vadd.f32 %v476_v47, %v444_v46  ;;  %v493_v2 = vadd.f32 %v477_v24, %v445_v56 }
 0x14a   :  { %v615_v18 = vsel %vm613_vm12, %v614_v52, %v612_v1  ;;  %643 = vst [vmem:[%s1211_s2 + $0x60] sm:$0xff] %v608_v43  ;;  %v500_v39 = vadd.f32 %v484_v61, %v452_v49  ;;  %v501_v31 = vadd.f32 %v485_v10, %v453_v23  ;;  %vm637_vm13 = vcmask 783360  }
 0x14b   :  { %644 = vst.msk [vmem:[%s1211_s2 + $0x68] sm:$0xff] %vm25_vm1, %v615_v18  ;;  %v508_v3 = vadd.f32 1.7087445e-14, %v492_v42  ;;  %v509_v26 = vadd.f32 1.7087445e-14, %v493_v2 }
 0x14c   :  { %v516_v27 = vadd.f32 1.7087445e-14, %v500_v39  ;;  %v517_v33 = vadd.f32 1.7087445e-14, %v501_v31 }
 0x14d   :  { %695 = vrsqrt.f32 %v508_v3  ;;  %vm562_vm14 = vcmp.eq.f32.partialorder %v508_v3, inf  ;;  %vm564_vm15 = vcmp.eq.f32.partialorder %v508_v3, 0.0  ;;  %v565_v11 = vand.u32 2147483648, %v508_v3 }
 0x14e   :  { %697 = vrsqrt.f32 %v509_v26  ;;  %vm569_vm0 = vcmp.eq.f32.partialorder %v509_v26, inf  ;;  %vm571_vm2 = vcmp.eq.f32.partialorder %v509_v26, 0.0  ;;  %v572_v19 = vand.u32 2147483648, %v509_v26 }
 0x14f   :  { %699 = vrsqrt.f32 %v516_v27  ;;  %vm618_vm1 = vcmp.eq.f32.partialorder %v516_v27, inf  ;;  %vm620_vm3 = vcmp.eq.f32.partialorder %v516_v27, 0.0  ;;  %v621_v51 = vand.u32 2147483648, %v516_v27 }
 0x150   :  { %701 = vrsqrt.f32 %v517_v33  ;;  %vm625_vm4 = vcmp.eq.f32.partialorder %v517_v33, inf  ;;  %v628_v52 = vand.u32 2147483648, %v517_v33  ;;  %vm627_vm5 = vcmp.eq.f32.partialorder %v517_v33, 0.0 }
 0x157   :  { %v696_v0 = vpop.eup %695 }
 0x158   :  { %v698_v45 = vpop.eup %697  ;;  %v561_v34 = vmul.f32 %v696_v0, %v508_v3 }
 0x159   :  { %v700_v12 = vpop.eup %699  ;;  %v568_v53 = vmul.f32 %v698_v45, %v509_v26 }
 0x15a   :  { %v702_v44 = vpop.eup %701  ;;  %v563_v6 = vsel %vm562_vm14, %v508_v3, %v561_v34  ;;  %v617_v8 = vmul.f32 %v700_v12, %v516_v27 }
 0x15b   :  { %v566_v14 = vsel %vm564_vm15, %v565_v11, %v563_v6  ;;  %v570_v16 = vsel %vm569_vm0, %v509_v26, %v568_v53  ;;  %v624_v15 = vmul.f32 %v702_v44, %v517_v33 }
 0x15c   :  { %v573_v32 = vsel %vm571_vm2, %v572_v19, %v570_v16  ;;  %v619_v5 = vsel %vm618_vm1, %v516_v27, %v617_v8  ;;  %636 = vst [vmem:[%s1211_s2 + $0x30] sm:$0x3f] %v566_v14 }
 0x15d   :  { %v622_v21 = vsel %vm620_vm3, %v621_v51, %v619_v5  ;;  %v626_v50 = vsel %vm625_vm4, %v517_v33, %v624_v15  ;;  %638 = vst.msk [vmem:[%s1211_s2 + $0x38] sm:$0x3f] %vm637_vm13, %v573_v32 }
 0x15e   :  { %v629_v17 = vsel %vm627_vm5, %v628_v52, %v626_v50  ;;  %645 = vst [vmem:[%s1211_s2 + $0x70] sm:$0x3f] %v622_v21 }
 0x15f   :  { %646 = vst.msk [vmem:[%s1211_s2 + $0x78] sm:$0x3f] %vm637_vm13, %v629_v17 }

</bundles_post_ra>
